<compile_context>
chip_gen: v7x
topology: tpu7x:2x2x1
jax: 0.10.0
libtpu: 0.0.40
codegen_flags: <defaults>
</compile_context>

<pallas_src>
import functools

import jax
import jax.numpy as jnp
from jax import lax
from jax.experimental import pallas as pl
from jax.experimental.pallas import tpu as pltpu

_LANE = 128
_SUBLANE = 8


def _round_up(x: int, m: int) -> int:
    return ((x + m - 1) // m) * m


def _dice_partial_kernel(p_ref, t_ref, out_ref, *, rows, block_rows, need_mask):
    """Per-block partial reduction.

    Writes a (1, 2, 128) output block:
      [0, 0, :] = per-lane sum over this block's rows of p * t
      [0, 1, :] = per-lane sum over this block's rows of p + t
    """
    i = pl.program_id(0)
    last = pl.num_programs(0) - 1

    def accumulate(p, t):
        # Lane-resident partials: one sublane reduce per quantity; the
        # cross-lane / cross-block fold happens once, in the JAX wrapper.
        out_ref[0, 0:1, :] = jnp.sum(p * t, axis=0, keepdims=True)
        out_ref[0, 1:2, :] = jnp.sum(p + t, axis=0, keepdims=True)

    if need_mask:
        # Hot path: every full block runs mask-free.
        @pl.when(i < last)
        def _():
            accumulate(p_ref[...].astype(jnp.float32),
                       t_ref[...].astype(jnp.float32))

        # Cold path: only the single, partial last block pays for the mask.
        @pl.when(i == last)
        def _():
            p = p_ref[...].astype(jnp.float32)
            t = t_ref[...].astype(jnp.float32)
            row_ids = i * block_rows + lax.broadcasted_iota(
                jnp.int32, p.shape, 0)
            valid = row_ids < rows
            p = jnp.where(valid, p, 0.0)
            t = jnp.where(valid, t, 0.0)
            accumulate(p, t)
    else:
        accumulate(p_ref[...].astype(jnp.float32),
                   t_ref[...].astype(jnp.float32))


def _pick_tiling(rows: int):
    """Generation-aware block size.

    Big enough to amortize the ~0.35 us per-grid-step overhead, small enough
    that the double-buffered working set (2 inputs x 2 pipeline buffers) stays
    comfortably inside VMEM on every generation (v7x only has 64 MiB).
    """
    try:
        vmem_cap = getattr(pltpu.get_tpu_info(), "vmem_capacity_bytes",
                           64 * 1024 * 1024)
    except Exception:  # conservative fallback
        vmem_cap = 64 * 1024 * 1024
    if vmem_cap >= 96 * 1024 * 1024:
        # v5e / v6e: 128 MiB physical VMEM -> 8 MiB per input block.
        max_rows, vmem_limit = 16384, 64 * 1024 * 1024
    else:
        # v7x: 64 MiB physical VMEM -> 4 MiB per input block.
        max_rows, vmem_limit = 8192, 32 * 1024 * 1024
    block_rows = min(max_rows, _round_up(rows, _SUBLANE))
    return block_rows, vmem_limit


def dice_loss(prediction, target, smooth: float = 1.0):
    """Pallas-TPU equivalent of DiceLoss.forward (returns the dice ratio)."""
    smooth = float(smooth)
    p_flat = jnp.ravel(prediction)
    t_flat = jnp.ravel(target)
    n = p_flat.shape[0]

    # Ragged (<128-element) tail handled in plain JAX: avoids materializing a
    # padded copy of both full inputs for lane-unaligned sizes.
    n_main = (n // _LANE) * _LANE
    rem = n - n_main
    if rem:
        p_tail = lax.slice(p_flat, (n_main,), (n,)).astype(jnp.float32)
        t_tail = lax.slice(t_flat, (n_main,), (n,)).astype(jnp.float32)
        tail_inter = jnp.sum(p_tail * t_tail)
        tail_denom = jnp.sum(p_tail) + jnp.sum(t_tail)
    else:
        tail_inter = jnp.float32(0.0)
        tail_denom = jnp.float32(0.0)

    if n_main == 0:
        # Fewer than 128 elements total: pure-JAX fallback.
        return (2.0 * tail_inter + smooth) / (tail_denom + smooth)

    p_main = p_flat if rem == 0 else lax.slice(p_flat, (0,), (n_main,))
    t_main = t_flat if rem == 0 else lax.slice(t_flat, (0,), (n_main,))
    rows = n_main // _LANE
    p2 = p_main.reshape(rows, _LANE)   # contiguous reshape: no copy
    t2 = t_main.reshape(rows, _LANE)

    block_rows, vmem_limit = _pick_tiling(rows)
    num_blocks = pl.cdiv(rows, block_rows)
    need_mask = (rows % block_rows) != 0

    cost = pl.CostEstimate(
        flops=3 * n_main,
        transcendentals=0,
        bytes_accessed=n_main * (p2.dtype.itemsize + t2.dtype.itemsize)
        + num_blocks * 2 * _LANE * 4,
    )

    partials = pl.pallas_call(
        functools.partial(
            _dice_partial_kernel,
            rows=rows,
            block_rows=block_rows,
            need_mask=need_mask,
        ),
        out_shape=jax.ShapeDtypeStruct((num_blocks, 2, _LANE), jnp.float32),
        grid_spec=pltpu.PrefetchScalarGridSpec(
            num_scalar_prefetch=0,
            grid=(num_blocks,),
            in_specs=[
                pl.BlockSpec((block_rows, _LANE), lambda i: (i, 0)),
                pl.BlockSpec((block_rows, _LANE), lambda i: (i, 0)),
            ],
            out_specs=pl.BlockSpec((1, 2, _LANE), lambda i: (i, 0, 0)),
        ),
        compiler_params=pltpu.CompilerParams(
            dimension_semantics=("parallel",),
            vmem_limit_bytes=vmem_limit,
        ),
        cost_estimate=cost,
    )(p2, t2)

    intersection = jnp.sum(partials[:, 0, :]) + tail_inter
    denom = jnp.sum(partials[:, 1, :]) + tail_denom
    return (2.0 * intersection + smooth) / (denom + smooth)


if __name__ == "__main__":
    key = jax.random.PRNGKey(0)
    kp, kt = jax.random.split(key)

    # NCHW, small shapes: batch=2, channels=4, spatial=16x16
    prediction = jax.random.uniform(kp, (2, 4, 16, 16), dtype=jnp.float32)
    target = (jax.random.uniform(kt, (2, 4, 16, 16)) > 0.5).astype(jnp.float32)

    smooth = 1.0
    result = jax.block_until_ready(dice_loss(prediction, target, smooth=smooth))

    # Pure-JAX reference check of the exact PyTorch semantics.
    iflat = prediction.reshape(-1)
    tflat = target.reshape(-1)
    ref = (2.0 * jnp.sum(iflat * tflat) + smooth) / (
        jnp.sum(iflat) + jnp.sum(tflat) + smooth)
    assert jnp.allclose(result, ref, rtol=1e-5, atol=1e-6), (result, ref)

    print("KERNEL_OK")
</pallas_src>

<mosaic_0001>
module attributes {stable_mosaic.version = 11 : i64} {
  func.func @_dice_partial_kernel(%arg0: i32, %arg1: memref<16x128xf32, #tpu.memory_space<vmem>>, %arg2: memref<16x128xf32, #tpu.memory_space<vmem>>, %arg3: memref<1x2x128xf32, #tpu.memory_space<vmem>>) attributes {dimension_semantics = [#tpu.dimension_semantics<parallel>], iteration_bounds = array<i64: 1>, scalar_prefetch = 0 : i64, scratch_operands = 0 : i64, tpu.core_type = #tpu.core_type<tc>, window_params = [{transform_indices = @transform_0, window_bounds = array<i64: 16, 128>}, {transform_indices = @transform_1, window_bounds = array<i64: 16, 128>}, {transform_indices = @transform_2, window_bounds = array<i64: 1, 2, 128>}]} {
    %c0 = arith.constant 0 : index
    %c0_0 = arith.constant 0 : index
    %0 = vector.load %arg1[%c0, %c0_0] : memref<16x128xf32, #tpu.memory_space<vmem>>, vector<16x128xf32>
    %c0_1 = arith.constant 0 : index
    %c0_2 = arith.constant 0 : index
    %1 = vector.load %arg2[%c0_1, %c0_2] : memref<16x128xf32, #tpu.memory_space<vmem>>, vector<16x128xf32>
    %2 = arith.mulf %0, %1 : vector<16x128xf32>
    %cst = arith.constant dense<0.000000e+00> : vector<128xf32>
    %3 = vector.multi_reduction <add>, %2, %cst [0] : vector<16x128xf32> to vector<128xf32>
    %4 = vector.shape_cast %3 : vector<128xf32> to vector<1x128xf32>
    %c0_3 = arith.constant 0 : index
    %c0_4 = arith.constant 0 : index
    %c0_5 = arith.constant 0 : index
    %5 = vector.load %arg3[%c0_3, %c0_4, %c0_5] : memref<1x2x128xf32, #tpu.memory_space<vmem>>, vector<1x1x128xf32>
    %6 = vector.shape_cast %5 : vector<1x1x128xf32> to vector<1x128xf32>
    %7 = vector.shape_cast %4 : vector<1x128xf32> to vector<1x1x128xf32>
    tpu.vector_store %arg3[%c0_3, %c0_4, %c0_5], %7 {strides = array<i32>} : memref<1x2x128xf32, #tpu.memory_space<vmem>>, vector<1x1x128xf32>,
    %8 = arith.addf %0, %1 : vector<16x128xf32>
    %cst_6 = arith.constant dense<0.000000e+00> : vector<128xf32>
    %9 = vector.multi_reduction <add>, %8, %cst_6 [0] : vector<16x128xf32> to vector<128xf32>
    %10 = vector.shape_cast %9 : vector<128xf32> to vector<1x128xf32>
    %c0_7 = arith.constant 0 : index
    %c1 = arith.constant 1 : index
    %c0_8 = arith.constant 0 : index
    %11 = vector.load %arg3[%c0_7, %c1, %c0_8] : memref<1x2x128xf32, #tpu.memory_space<vmem>>, vector<1x1x128xf32>
    %12 = vector.shape_cast %11 : vector<1x1x128xf32> to vector<1x128xf32>
    %13 = vector.shape_cast %10 : vector<1x128xf32> to vector<1x1x128xf32>
    tpu.vector_store %arg3[%c0_7, %c1, %c0_8], %13 {strides = array<i32>} : memref<1x2x128xf32, #tpu.memory_space<vmem>>, vector<1x1x128xf32>,
    return
  }
  func.func @transform_0(%arg0: i32) -> (i32, i32) {
    %c0_i32 = arith.constant 0 : i32
    %c0_i32_0 = arith.constant 0 : i32
    return %arg0, %c0_i32 : i32, i32
  }
  func.func @transform_1(%arg0: i32) -> (i32, i32) {
    %c0_i32 = arith.constant 0 : i32
    %c0_i32_0 = arith.constant 0 : i32
    return %arg0, %c0_i32 : i32, i32
  }
  func.func @transform_2(%arg0: i32) -> (i32, i32, i32) {
    %c0_i32 = arith.constant 0 : i32
    %c0_i32_0 = arith.constant 0 : i32
    %c0_i32_1 = arith.constant 0 : i32
    return %arg0, %c0_i32, %c0_i32_0 : i32, i32, i32
  }
}

</mosaic_0001>

<bundles_post_ra>
// kernel: tpu_custom_call.1
= control target key start
LH: loop header
LB: loop body
LE: loop exit
PB: predicated region body
PF: predicated region fallthrough
CT: control target
= control target key end

     0   :  { %7 = vsyncpa [#allocation3], 0  ;;  %s213_s0 = inlined_call_operand.hbm [shape: f32[16,128], index: 0, kind: input, shape index: {}]   ;;  %s214_s1 = inlined_call_operand.hbm [shape: f32[16,128], index: 1, kind: input, shape index: {}]   ;;  %s215_s2 = inlined_call_operand.hbm [shape: f32[1,2,128], index: 2, kind: output, shape index: {}]  }
   0x1   :  { %8 = vsyncpa [#allocation6], 0 }
   0x2   :  { %9 = vsyncpa [#allocation4], 0  ;;  %s157_s9 = smov [#allocation2]   ;;  %s85_s13 = scalar_lea.hbm %s213_s0, 256 }
   0x3   :  { %s15_s10 = sshll.u32 %s157_s9, 4  ;;  %p86_p0 = scmp.ne.s32.totalorder %s213_s0, %s85_s13  ;;  %s16_s10 = int_to_ptr.vmem [resolvable:$true] %s15_s10 }
   0x4   :  { %p89_p1 = scmp.lt.u32.totalorder %s85_s13, %s213_s0 }
   0x6   :  { %p91_p2 = pnand %p89_p1, %p86_p0 }
   0x8   :  { %94 = shalt.err (!%p91_p2)
}
   0x9   :  { %s95_s18 = scalar_lea.vmem %s16_s10, 256  ;;  %p100_p4 = scmp.lt.s32.totalorder %s16_s10, %s16_s10 }
   0xa   :  { %p96_p3 = scmp.ne.s32.totalorder %s16_s10, %s95_s18  ;;  %p101_p5 = scmp.lt.s32.totalorder %s95_s18, %s95_s18 }
   0xc   :  { %p102_p6 = por %p101_p5, %p100_p4 }
   0xe   :  { %p103_p7 = pnand %p102_p6, %p96_p3 }
  0x10   :  { %106 = shalt.err (!%p103_p7)
}
  0x11   :  { %s158_s19 = smov 128   ;;  %s159_s20 = smov 8  }
  0x12   :  { %21 = dma.hbm_to_vmem [thread:$0]  %s213_s0, 256, %s16_s10, [#allocation3], %s158_s19, %s158_s19, %s159_s20  }
  0x13   :  { %s160_s23 = smov [#allocation5]   ;;  %s107_s27 = scalar_lea.hbm %s214_s1, 256 }
  0x14   :  { %s27_s24 = sshll.u32 %s160_s23, 4  ;;  %p108_p8 = scmp.ne.s32.totalorder %s214_s1, %s107_s27  ;;  %s28_s24 = int_to_ptr.vmem [resolvable:$true] %s27_s24 }
  0x15   :  { %p111_p9 = scmp.lt.u32.totalorder %s107_s27, %s214_s1 }
  0x17   :  { %p113_p10 = pnand %p111_p9, %p108_p8 }
  0x19   :  { %116 = shalt.err (!%p113_p10)
}
  0x1a   :  { %s117_s4 = scalar_lea.vmem %s28_s24, 256  ;;  %p122_p12 = scmp.lt.s32.totalorder %s28_s24, %s28_s24 }
  0x1b   :  { %p118_p11 = scmp.ne.s32.totalorder %s28_s24, %s117_s4  ;;  %p123_p13 = scmp.lt.s32.totalorder %s117_s4, %s117_s4 }
  0x1d   :  { %p124_p0 = por %p123_p13, %p122_p12 }
  0x1f   :  { %p125_p1 = pnand %p124_p0, %p118_p11 }
  0x21   :  { %128 = shalt.err (!%p125_p1)
}
  0x22   :  { %33 = dma.hbm_to_vmem [thread:$0]  %s214_s1, 256, %s28_s24, [#allocation6], %s158_s19, %s158_s19, %s159_s20  }
  0x23   :  { %151 = dma.done.wait [#allocation3], 256  }
  0x24   :  { %152 = vsyncadd [#allocation3], 4294967040 }
  0x25   :  { %153 = dma.done.wait [#allocation6], 256  }
  0x26   :  { %154 = vsyncadd [#allocation6], 4294967040  ;;  %v40_v0 = vld [vmem:[#allocation2] sm:$0xff]  ;;  %v41_v1 = vld [vmem:[#allocation2 + $0x8] sm:$0xff]  ;;  %s161_s1 = smov [#allocation7]  }
  0x27   :  { %v42_v2 = vld [vmem:[#allocation5] sm:$0xff]  ;;  %v43_v3 = vld [vmem:[#allocation5 + $0x8] sm:$0xff]  ;;  %s70_s6 = sshll.u32 %s161_s1, 4  ;;  %s71_s6 = int_to_ptr.vmem [resolvable:$true] %s70_s6 }
  0x28   :  { %v44_v4 = vmul.f32 %v42_v2, %v40_v0  ;;  %v54_v5 = vadd.f32 %v42_v2, %v40_v0  ;;  %v45_v6 = vmul.f32 %v43_v3, %v41_v1  ;;  %v55_v7 = vadd.f32 %v43_v3, %v41_v1  ;;  %s129_s7 = scalar_lea.vmem %s71_s6, 32  ;;  %p134_p3 = scmp.lt.s32.totalorder %s71_s6, %s71_s6 }
  0x29   :  { %p130_p2 = scmp.ne.s32.totalorder %s71_s6, %s129_s7  ;;  %p135_p4 = scmp.lt.s32.totalorder %s129_s7, %s129_s7 }
  0x2a   :  { %v46_v8 = vadd.f32 %v45_v6, %v44_v4  ;;  %v56_v9 = vadd.f32 %v55_v7, %v54_v5 }
  0x2b   :  { %p136_p5 = por %p135_p4, %p134_p3 }
  0x2c   :  { %v47_v10 = vrot.slane %v46_v8, 4  ;;  %v57_v11 = vrot.slane %v56_v9, 4 }
  0x2d   :  { %p137_p6 = pnand %p136_p5, %p130_p2 }
  0x2e   :  { %v48_v12 = vadd.f32 %v47_v10, %v46_v8  ;;  %v58_v13 = vadd.f32 %v57_v11, %v56_v9 }
  0x30   :  { %v49_v14 = vrot.slane %v48_v12, 2  ;;  %v59_v15 = vrot.slane %v58_v13, 2 }
  0x32   :  { %v50_v16 = vadd.f32 %v49_v14, %v48_v12  ;;  %v60_v17 = vadd.f32 %v59_v15, %v58_v13 }
  0x34   :  { %v51_v18 = vrot.slane %v50_v16, 1  ;;  %v61_v19 = vrot.slane %v60_v17, 1 }
  0x36   :  { %v52_v20 = vadd.f32 %v51_v18, %v50_v16  ;;  %v62_v21 = vadd.f32 %v61_v19, %v60_v17 }
  0x38   :  { %53 = vst [vmem:[#allocation7] sm:$0x1] %v52_v20  ;;  %63 = vst [vmem:[#allocation7 + $0x1] sm:$0x1] %v62_v21 }
  0x39   :  { %140 = shalt.err (!%p137_p6)
}
  0x3a   :  { %s141_s10 = scalar_lea.hbm %s215_s2, 32 }
  0x3b   :  { %p142_p7 = scmp.ne.s32.totalorder %s215_s2, %s141_s10  ;;  %p145_p8 = scmp.lt.u32.totalorder %s141_s10, %s215_s2 }
  0x3d   :  { %p147_p9 = pnand %p145_p8, %p142_p7 }
  0x3f   :  { %150 = shalt.err (!%p147_p9)
}
  0x40   :  { %73 = dma.vmem_to_hbm [thread:$0]  %s71_s6, 32, %s215_s2, [#allocation4]  }
  0x41   :  { %155 = dma.done.wait [#allocation4], 32  }
  0x42   :  { %156 = vsyncadd [#allocation4], 4294967264 }
  0x43   :  { %77 = vsyncpa [#allocation3], 1 }
  0x44   :  { %78 = vsyncpa [#allocation6], 1 }
  0x45   :  { %79 = vsyncpa [#allocation4], 1 }

</bundles_post_ra>
